<compile_context>
chip_gen: v7x
topology: tpu7x:2x2x1
jax: 0.10.0
libtpu: 0.0.40
codegen_flags: <defaults>
</compile_context>

<pallas_src>
import functools

import jax
import jax.numpy as jnp
from jax.experimental import pallas as pl
from jax.experimental.pallas import tpu as pltpu

_MASK_FILL = -1e30  # finite "minus infinity": avoids inf arithmetic / NaN rows


def _round_up(x, m):
    return (x + m - 1) // m * m


def _pick_tile(dim, target, multiple):
    """Largest divisor of `dim` that is a multiple of `multiple` and <= target."""
    if dim <= target:
        return dim
    target = max(target, multiple)
    best = multiple if dim % multiple == 0 else dim
    for t in range(multiple, target + 1, multiple):
        if dim % t == 0:
            best = t
    return best


def _vmem_limit(need_bytes):
    limit = max(int(need_bytes * 3 // 2), 32 * 2 ** 20)
    limit = min(limit, 48 * 2 ** 20)            # headroom on v7x's 64 MiB VMEM
    return int(max(limit, need_bytes + (2 << 20)))


# ---------------------------------------------------------------------------
# Fused flash-attention + fc_out kernel
#   grid: (N, Q_tiles, KV_tiles); all heads processed per step; KV is reduction.
# ---------------------------------------------------------------------------
def _flash_fc_kernel(q_ref, k_ref, v_ref, bias_ref, w_ref, b_ref, o_ref,
                     qs_sc, m_sc, l_sc, acc_sc, *, scale, heads):
    kv = pl.program_id(2)

    @pl.when(kv == 0)
    def _init():
        # Hoist the softmax scale + bf16 cast of q out of the KV loop.
        qs_sc[...] = (q_ref[0].astype(jnp.float32) * scale).astype(jnp.bfloat16)
        m_sc[...] = jnp.full_like(m_sc, -jnp.inf)
        l_sc[...] = jnp.zeros_like(l_sc)
        acc_sc[...] = jnp.zeros_like(acc_sc)

    k = k_ref[0].astype(jnp.bfloat16)          # (H, tk, D)  bf16 MXU operand
    v = v_ref[0].astype(jnp.bfloat16)          # (H, tk, D)

    # Batched Q.K^T over all heads; contract head_dim directly (no K transpose).
    s = jnp.einsum('hqd,hkd->hqk', qs_sc[...], k,
                   preferred_element_type=jnp.float32)             # (H, tq, tk)
    s = s + bias_ref[...].astype(jnp.float32)                      # 0 / -1e30 bias

    m_prev = m_sc[...]
    m_new = jnp.maximum(m_prev, jnp.max(s, axis=-1, keepdims=True))
    alpha = jnp.exp(m_prev - m_new)
    p = jnp.exp(s - m_new)

    l_sc[...] = alpha * l_sc[...] + jnp.sum(p, axis=-1, keepdims=True)
    acc_sc[...] = alpha * acc_sc[...] + jnp.einsum(
        'hqk,hkd->hqd', p.astype(jnp.bfloat16), v,
        preferred_element_type=jnp.float32)
    m_sc[...] = m_new

    @pl.when(kv == pl.num_programs(2) - 1)
    def _finalize():
        inv_l = pl.reciprocal(l_sc[...], approx=True)              # (H, tq, 1)
        attn = (acc_sc[...] * inv_l).astype(jnp.bfloat16)          # (H, tq, D)
        # Fused fc_out: per-head grouped matmul with the VMEM-resident bf16 weight.
        out = b_ref[...].astype(jnp.float32)                       # (1, E)
        for h in range(heads):
            out = out + jnp.dot(attn[h], w_ref[h],
                                preferred_element_type=jnp.float32)
        o_ref[0] = out.astype(o_ref.dtype)


def _fused_attention_fc(q, k, v, bias, w_hde, b_1e, scale, out_dtype,
                        *, q_tile, kv_tile):
    """q,k,v: (N,H,L,D); bias: (N,Qp,Kp) bf16; w: (H,D,E) bf16; b: (1,E) f32."""
    N, H, Qp, D = q.shape
    Kp = k.shape[2]
    E = w_hde.shape[2]
    tq = _pick_tile(Qp, q_tile, 8)       # sublane-aligned Q tile
    tk = _pick_tile(Kp, kv_tile, 128)    # lane-aligned KV tile
    grid = (N, Qp // tq, Kp // tk)

    itm = q.dtype.itemsize
    out_itm = jnp.dtype(out_dtype).itemsize
    pipelined = (H * tq * D * itm                 # q block
                 + 2 * H * tk * D * itm           # k + v blocks
                 + tq * tk * 2                    # bias block (bf16)
                 + tq * E * out_itm)              # output block
    resident = H * D * E * 2 + E * 4              # fc weight + bias (constant index)
    scratch = H * tq * D * 2 + 2 * H * tq * 4 + H * tq * D * 4
    temps = 2 * H * tq * tk * 4                   # s / p f32 intermediates
    need = 2 * pipelined + resident + scratch + temps

    kernel = functools.partial(_flash_fc_kernel, scale=scale, heads=H)
    return pl.pallas_call(
        kernel,
        out_shape=jax.ShapeDtypeStruct((N, Qp, E), out_dtype),
        grid_spec=pltpu.PrefetchScalarGridSpec(
            num_scalar_prefetch=0,
            grid=grid,
            in_specs=[
                pl.BlockSpec((1, H, tq, D), lambda n, qi, ki: (n, 0, qi, 0)),
                pl.BlockSpec((1, H, tk, D), lambda n, qi, ki: (n, 0, ki, 0)),
                pl.BlockSpec((1, H, tk, D), lambda n, qi, ki: (n, 0, ki, 0)),
                # mask bias shared across heads: read once per (n, q-tile, kv-tile)
                pl.BlockSpec((1, tq, tk), lambda n, qi, ki: (n, qi, ki)),
                # fc weight/bias: constant block index -> DMA'd once, VMEM-resident
                pl.BlockSpec((H, D, E), lambda n, qi, ki: (0, 0, 0)),
                pl.BlockSpec((1, E), lambda n, qi, ki: (0, 0)),
            ],
            out_specs=pl.BlockSpec((1, tq, E), lambda n, qi, ki: (n, qi, 0)),
            scratch_shapes=[
                pltpu.VMEM((H, tq, D), jnp.bfloat16),   # scaled bf16 q
                pltpu.VMEM((H, tq, 1), jnp.float32),    # running max
                pltpu.VMEM((H, tq, 1), jnp.float32),    # running denominator
                pltpu.VMEM((H, tq, D), jnp.float32),    # output accumulator
            ],
        ),
        compiler_params=pltpu.CompilerParams(
            dimension_semantics=("parallel", "parallel", "arbitrary"),
            vmem_limit_bytes=_vmem_limit(need)),
        cost_estimate=pl.CostEstimate(
            flops=int(4 * N * H * Qp * Kp * D + 2 * N * Qp * E * E),
            transcendentals=int(N * H * Qp * Kp),
            bytes_accessed=int(q.size * itm + k.size * itm + v.size * itm
                               + bias.size * 2 + w_hde.size * 2 + E * 4
                               + N * Qp * E * out_itm)),
    )(q, k, v, bias, w_hde, b_1e)


# ---------------------------------------------------------------------------
# Module wrapper
# ---------------------------------------------------------------------------
class SelfAttentionPallas:
    def __init__(self, embed_size, heads, key):
        assert embed_size % heads == 0, "Embedding size must be divisible by heads"
        self.embed_size = embed_size
        self.heads = heads
        self.head_dim = embed_size // heads
        kw, kb = jax.random.split(key)
        bound = 1.0 / (embed_size ** 0.5)
        # PyTorch Linear convention: weight (out_features, in_features), bias (out,)
        self.fc_w = jax.random.uniform(kw, (embed_size, embed_size),
                                       jnp.float32, -bound, bound)
        self.fc_b = jax.random.uniform(kb, (embed_size,),
                                       jnp.float32, -bound, bound)
        # Per-head bf16 weight, transposed once here (not per call):
        #   fc(x) = x @ W^T + b  with x laid out as [h*D + d]  =>  w_hde[h] = W^T[hD:(h+1)D]
        self.w_hde = jnp.asarray(self.fc_w.T.reshape(heads, self.head_dim, embed_size),
                                 dtype=jnp.bfloat16)
        self.fc_b2d = self.fc_b.reshape(1, embed_size)
        # NOTE: the torch module's self.values/self.keys/self.queries Linear layers
        # are never applied in its forward(), so they are omitted here.

    def __call__(self, values, keys, query, mask, *, q_tile=256, kv_tile=512):
        # On v5e/v6e (128 MiB VMEM) kv_tile=1024 amortizes grid-step overhead further;
        # defaults are chosen to also fit v7x's 64 MiB VMEM with all heads per block.
        N, q_len, _ = query.shape
        k_len, v_len = keys.shape[1], values.shape[1]
        assert k_len == v_len, "key_len must equal value_len"
        H, D, E = self.heads, self.head_dim, self.embed_size

        # (N, L, E) -> (N, H, L, D): one XLA relayout per input.
        # TODO(synk): when head_dim % 128 == 0 the head slices can be read straight
        # from the (N, L, E) arrays via the BlockSpec index_map, skipping this transpose.
        q = query.reshape(N, q_len, H, D).transpose(0, 2, 1, 3)
        k = keys.reshape(N, k_len, H, D).transpose(0, 2, 1, 3)
        v = values.reshape(N, v_len, H, D).transpose(0, 2, 1, 3)

        # Mask -> additive bias (0 kept / -1e30 masked), shared across heads.
        # TODO(synk): for causal masks, scalar-prefetch per-q-tile KV extents to skip
        # fully-masked KV tiles and generate the triangular mask in-kernel (~2x fewer steps).
        if mask is None:
            bias = jnp.zeros((N, q_len, k_len), jnp.float32)
        else:
            m = jnp.broadcast_to(mask, (N, 1, q_len, k_len))[:, 0]
            bias = jnp.where(m == 0, _MASK_FILL, 0.0).astype(jnp.float32)

        # Pad sequence lengths to (8, 128)-aligned tiles; padded keys are masked out,
        # padded query rows are sliced off below.
        q_pad = _round_up(q_len, 8)
        k_pad = _round_up(k_len, 128)
        if q_pad != q_len:
            q = jnp.pad(q, ((0, 0), (0, 0), (0, q_pad - q_len), (0, 0)))
        if k_pad != k_len:
            k = jnp.pad(k, ((0, 0), (0, 0), (0, k_pad - k_len), (0, 0)))
            v = jnp.pad(v, ((0, 0), (0, 0), (0, k_pad - k_len), (0, 0)))
        if (q_pad != q_len) or (k_pad != k_len):
            bias = jnp.pad(bias, ((0, 0), (0, q_pad - q_len), (0, k_pad - k_len)),
                           constant_values=_MASK_FILL)
        bias = bias.astype(jnp.bfloat16)

        scale = float(E) ** (-0.5)
        # TODO(synk): for very large embed_size (w_hde + per-step blocks > ~40 MiB VMEM)
        # split fc_out back into a second pallas_call tiled over E.
        out = _fused_attention_fc(q, k, v, bias, self.w_hde, self.fc_b2d,
                                  scale, query.dtype,
                                  q_tile=q_tile, kv_tile=kv_tile)   # (N, Qp, E)
        return out[:, :q_len, :]


def _reference(module, values, keys, query, mask):
    """Pure-JAX f32 reference mirroring the PyTorch forward."""
    N, q_len, _ = query.shape
    H, D = module.heads, module.head_dim
    v = values.reshape(N, -1, H, D)
    k = keys.reshape(N, -1, H, D)
    q = query.reshape(N, q_len, H, D)
    energy = jnp.einsum("nqhd,nkhd->nhqk", q, k)
    if mask is not None:
        energy = jnp.where(mask == 0, -jnp.inf, energy)
    attn = jax.nn.softmax(energy * module.embed_size ** (-0.5), axis=3)
    out = jnp.einsum("nhql,nlhd->nqhd", attn, v).reshape(N, q_len, H * D)
    return out @ module.fc_w.T + module.fc_b


if __name__ == "__main__":
    key = jax.random.PRNGKey(0)
    k_mod, k_v, k_k, k_q = jax.random.split(key, 4)

    # --- small-shape test (single Q/KV tile, exercises K padding to 128) ---
    N, seq, embed_size, heads = 2, 8, 32, 2
    module = SelfAttentionPallas(embed_size, heads, k_mod)

    values = jax.random.normal(k_v, (N, seq, embed_size), jnp.float32)
    keys = jax.random.normal(k_k, (N, seq, embed_size), jnp.float32)
    query = jax.random.normal(k_q, (N, seq, embed_size), jnp.float32)
    mask = jnp.tril(jnp.ones((seq, seq), jnp.int32))[None, None, :, :]
    mask = jnp.broadcast_to(mask, (N, 1, seq, seq))

    out = jax.block_until_ready(module(values, keys, query, mask))
    ref = _reference(module, values, keys, query, mask)
    assert out.shape == (N, seq, embed_size)
    # bf16 MXU operands => looser tolerance than the pure-f32 reference
    assert jnp.allclose(out, ref, atol=5e-2, rtol=5e-2), "mismatch vs reference (small)"

    # --- multi-tile test: exercises the online-softmax KV accumulation path ---
    N2, seq2 = 1, 256
    k_v2, k_k2, k_q2 = jax.random.split(jax.random.PRNGKey(1), 3)
    values2 = jax.random.normal(k_v2, (N2, seq2, embed_size), jnp.float32)
    keys2 = jax.random.normal(k_k2, (N2, seq2, embed_size), jnp.float32)
    query2 = jax.random.normal(k_q2, (N2, seq2, embed_size), jnp.float32)
    mask2 = jnp.broadcast_to(
        jnp.tril(jnp.ones((seq2, seq2), jnp.int32))[None, None, :, :],
        (N2, 1, seq2, seq2))

    out2 = jax.block_until_ready(
        module(values2, keys2, query2, mask2, q_tile=128, kv_tile=128))
    ref2 = _reference(module, values2, keys2, query2, mask2)
    assert jnp.allclose(out2, ref2, atol=5e-2, rtol=5e-2), "mismatch vs reference (tiled)"

    print("KERNEL_OK")
</pallas_src>

<mosaic_0001>
module attributes {stable_mosaic.version = 11 : i64} {
  func.func @_flash_fc_kernel(%arg0: i32, %arg1: i32, %arg2: i32, %arg3: memref<1x2x8x16xf32, #tpu.memory_space<vmem>>, %arg4: memref<1x2x128x16xf32, #tpu.memory_space<vmem>>, %arg5: memref<1x2x128x16xf32, #tpu.memory_space<vmem>>, %arg6: memref<1x8x128xbf16, #tpu.memory_space<vmem>>, %arg7: memref<2x16x32xbf16, #tpu.memory_space<vmem>>, %arg8: memref<1x32xf32, #tpu.memory_space<vmem>>, %arg9: memref<1x8x32xf32, #tpu.memory_space<vmem>>, %arg10: memref<2x8x16xbf16, #tpu.memory_space<vmem>>, %arg11: memref<2x8x1xf32, #tpu.memory_space<vmem>>, %arg12: memref<2x8x1xf32, #tpu.memory_space<vmem>>, %arg13: memref<2x8x16xf32, #tpu.memory_space<vmem>>) attributes {dimension_semantics = [#tpu.dimension_semantics<parallel>, #tpu.dimension_semantics<parallel>, #tpu.dimension_semantics<arbitrary>], iteration_bounds = array<i64: 2, 1, 1>, scalar_prefetch = 0 : i64, scratch_operands = 4 : i64, tpu.core_type = #tpu.core_type<tc>, window_params = [{transform_indices = @transform_0, window_bounds = array<i64: 1, 2, 8, 16>}, {transform_indices = @transform_1, window_bounds = array<i64: 1, 2, 128, 16>}, {transform_indices = @transform_2, window_bounds = array<i64: 1, 2, 128, 16>}, {transform_indices = @transform_3, window_bounds = array<i64: 1, 8, 128>}, {pipeline_mode = #tpu.pipeline_mode<synchronous>, transform_indices = @transform_4, window_bounds = array<i64: 2, 16, 32>}, {pipeline_mode = #tpu.pipeline_mode<synchronous>, transform_indices = @transform_5, window_bounds = array<i64: 1, 32>}, {transform_indices = @transform_6, window_bounds = array<i64: 1, 8, 32>}]} {
    %c0_i32 = arith.constant 0 : i32
    %0 = arith.cmpi eq, %arg2, %c0_i32 : i32
    %1 = arith.extui %0 : i1 to i32
    %c0_i32_0 = arith.constant 0 : i32
    %2 = arith.cmpi ne, %1, %c0_i32_0 : i32
    scf.if %2 {
      %c0_37 = arith.constant 0 : index
      %c0_38 = arith.constant 0 : index
      %c0_39 = arith.constant 0 : index
      %c0_40 = arith.constant 0 : index
      %41 = vector.load %arg3[%c0_37, %c0_38, %c0_39, %c0_40] : memref<1x2x8x16xf32, #tpu.memory_space<vmem>>, vector<1x2x8x16xf32>
      %42 = vector.shape_cast %41 : vector<1x2x8x16xf32> to vector<2x8x16xf32>
      %cst_41 = arith.constant 0.176776692 : f32
      %43 = vector.broadcast %cst_41 : f32 to vector<2x8x16xf32>
      %44 = arith.mulf %42, %43 : vector<2x8x16xf32>
      %45 = arith.truncf %44 : vector<2x8x16xf32> to vector<2x8x16xbf16>
      %c0_42 = arith.constant 0 : index
      %c0_43 = arith.constant 0 : index
      %c0_44 = arith.constant 0 : index
      %46 = vector.load %arg10[%c0_42, %c0_43, %c0_44] : memref<2x8x16xbf16, #tpu.memory_space<vmem>>, vector<2x8x16xbf16>
      tpu.vector_store %arg10[%c0_42, %c0_43, %c0_44], %45 {strides = array<i32>} : memref<2x8x16xbf16, #tpu.memory_space<vmem>>, vector<2x8x16xbf16>,
      %cst_45 = arith.constant 0xFF800000 : f32
      %47 = vector.broadcast %cst_45 : f32 to vector<2x8x1xf32>
      %c0_46 = arith.constant 0 : index
      %c0_47 = arith.constant 0 : index
      %c0_48 = arith.constant 0 : index
      %48 = vector.load %arg11[%c0_46, %c0_47, %c0_48] : memref<2x8x1xf32, #tpu.memory_space<vmem>>, vector<2x8x1xf32>
      tpu.vector_store %arg11[%c0_46, %c0_47, %c0_48], %47 {strides = array<i32>} : memref<2x8x1xf32, #tpu.memory_space<vmem>>, vector<2x8x1xf32>,
      %cst_49 = arith.constant 0.000000e+00 : f32
      %49 = vector.broadcast %cst_49 : f32 to vector<2x8x1xf32>
      %c0_50 = arith.constant 0 : index
      %c0_51 = arith.constant 0 : index
      %c0_52 = arith.constant 0 : index
      %50 = vector.load %arg12[%c0_50, %c0_51, %c0_52] : memref<2x8x1xf32, #tpu.memory_space<vmem>>, vector<2x8x1xf32>
      tpu.vector_store %arg12[%c0_50, %c0_51, %c0_52], %49 {strides = array<i32>} : memref<2x8x1xf32, #tpu.memory_space<vmem>>, vector<2x8x1xf32>,
      %cst_53 = arith.constant 0.000000e+00 : f32
      %51 = vector.broadcast %cst_53 : f32 to vector<2x8x16xf32>
      %c0_54 = arith.constant 0 : index
      %c0_55 = arith.constant 0 : index
      %c0_56 = arith.constant 0 : index
      %52 = vector.load %arg13[%c0_54, %c0_55, %c0_56] : memref<2x8x16xf32, #tpu.memory_space<vmem>>, vector<2x8x16xf32>
      tpu.vector_store %arg13[%c0_54, %c0_55, %c0_56], %51 {strides = array<i32>} : memref<2x8x16xf32, #tpu.memory_space<vmem>>, vector<2x8x16xf32>,
    } else {
    }
    %c0 = arith.constant 0 : index
    %c0_1 = arith.constant 0 : index
    %c0_2 = arith.constant 0 : index
    %c0_3 = arith.constant 0 : index
    %3 = vector.load %arg4[%c0, %c0_1, %c0_2, %c0_3] : memref<1x2x128x16xf32, #tpu.memory_space<vmem>>, vector<1x2x128x16xf32>
    %4 = vector.shape_cast %3 : vector<1x2x128x16xf32> to vector<2x128x16xf32>
    %5 = arith.truncf %4 : vector<2x128x16xf32> to vector<2x128x16xbf16>
    %c0_4 = arith.constant 0 : index
    %c0_5 = arith.constant 0 : index
    %c0_6 = arith.constant 0 : index
    %c0_7 = arith.constant 0 : index
    %6 = vector.load %arg5[%c0_4, %c0_5, %c0_6, %c0_7] : memref<1x2x128x16xf32, #tpu.memory_space<vmem>>, vector<1x2x128x16xf32>
    %7 = vector.shape_cast %6 : vector<1x2x128x16xf32> to vector<2x128x16xf32>
    %8 = arith.truncf %7 : vector<2x128x16xf32> to vector<2x128x16xbf16>
    %c0_8 = arith.constant 0 : index
    %c0_9 = arith.constant 0 : index
    %c0_10 = arith.constant 0 : index
    %9 = vector.load %arg10[%c0_8, %c0_9, %c0_10] : memref<2x8x16xbf16, #tpu.memory_space<vmem>>, vector<2x8x16xbf16>
    "tpu.trace_start"() <{level = 10 : i32, message = "hqd,hkd->hqk"}> : () -> ()
    %cst = arith.constant dense<0.000000e+00> : vector<2x8x128xf32>
    %10 = tpu.matmul %9, %5, %cst {dimension_numbers = #tpu.dot_dimension_numbers<[2], [2], [1], [1], [0, 0, 0, 1, 1, 1], [0], [0]>} : vector<2x8x16xbf16>, vector<2x128x16xbf16>, vector<2x8x128xf32> -> vector<2x8x128xf32>
    "tpu.trace_stop"() : () -> ()
    %c0_11 = arith.constant 0 : index
    %c0_12 = arith.constant 0 : index
    %c0_13 = arith.constant 0 : index
    %11 = vector.load %arg6[%c0_11, %c0_12, %c0_13] : memref<1x8x128xbf16, #tpu.memory_space<vmem>>, vector<1x8x128xbf16>
    %12 = arith.extf %11 : vector<1x8x128xbf16> to vector<1x8x128xf32>
    %13 = vector.broadcast %12 : vector<1x8x128xf32> to vector<2x8x128xf32>
    %14 = arith.addf %10, %13 : vector<2x8x128xf32>
    %c0_14 = arith.constant 0 : index
    %c0_15 = arith.constant 0 : index
    %c0_16 = arith.constant 0 : index
    %15 = vector.load %arg11[%c0_14, %c0_15, %c0_16] : memref<2x8x1xf32, #tpu.memory_space<vmem>>, vector<2x8x1xf32>
    %cst_17 = arith.constant dense<0xFF800000> : vector<2x8xf32>
    %16 = vector.multi_reduction <maximumf>, %14, %cst_17 [2] : vector<2x8x128xf32> to vector<2x8xf32>
    %17 = vector.shape_cast %16 : vector<2x8xf32> to vector<2x8x1xf32>
    %18 = arith.maximumf %15, %17 : vector<2x8x1xf32>
    %19 = arith.subf %15, %18 : vector<2x8x1xf32>
    %20 = math.exp %19 : vector<2x8x1xf32>
    %21 = vector.broadcast %18 : vector<2x8x1xf32> to vector<2x8x128xf32>
    %22 = arith.subf %14, %21 : vector<2x8x128xf32>
    %23 = math.exp %22 : vector<2x8x128xf32>
    %c0_18 = arith.constant 0 : index
    %c0_19 = arith.constant 0 : index
    %c0_20 = arith.constant 0 : index
    %24 = vector.load %arg12[%c0_18, %c0_19, %c0_20] : memref<2x8x1xf32, #tpu.memory_space<vmem>>, vector<2x8x1xf32>
    %25 = arith.mulf %20, %24 : vector<2x8x1xf32>
    %cst_21 = arith.constant dense<0.000000e+00> : vector<2x8xf32>
    %26 = vector.multi_reduction <add>, %23, %cst_21 [2] : vector<2x8x128xf32> to vector<2x8xf32>
    %27 = vector.shape_cast %26 : vector<2x8xf32> to vector<2x8x1xf32>
    %28 = arith.addf %25, %27 : vector<2x8x1xf32>
    %c0_22 = arith.constant 0 : index
    %c0_23 = arith.constant 0 : index
    %c0_24 = arith.constant 0 : index
    %29 = vector.load %arg12[%c0_22, %c0_23, %c0_24] : memref<2x8x1xf32, #tpu.memory_space<vmem>>, vector<2x8x1xf32>
    tpu.vector_store %arg12[%c0_22, %c0_23, %c0_24], %28 {strides = array<i32>} : memref<2x8x1xf32, #tpu.memory_space<vmem>>, vector<2x8x1xf32>,
    %c0_25 = arith.constant 0 : index
    %c0_26 = arith.constant 0 : index
    %c0_27 = arith.constant 0 : index
    %30 = vector.load %arg13[%c0_25, %c0_26, %c0_27] : memref<2x8x16xf32, #tpu.memory_space<vmem>>, vector<2x8x16xf32>
    %31 = vector.broadcast %20 : vector<2x8x1xf32> to vector<2x8x16xf32>
    %32 = arith.mulf %31, %30 : vector<2x8x16xf32>
    %33 = arith.truncf %23 : vector<2x8x128xf32> to vector<2x8x128xbf16>
    "tpu.trace_start"() <{level = 10 : i32, message = "hqk,hkd->hqd"}> : () -> ()
    %cst_28 = arith.constant dense<0.000000e+00> : vector<2x8x16xf32>
    %34 = tpu.matmul %33, %8, %cst_28 {dimension_numbers = #tpu.dot_dimension_numbers<[2], [1], [1], [2], [0, 0, 0, 1, 1, 2], [0], [0]>} : vector<2x8x128xbf16>, vector<2x128x16xbf16>, vector<2x8x16xf32> -> vector<2x8x16xf32>
    "tpu.trace_stop"() : () -> ()
    %35 = arith.addf %32, %34 : vector<2x8x16xf32>
    %c0_29 = arith.constant 0 : index
    %c0_30 = arith.constant 0 : index
    %c0_31 = arith.constant 0 : index
    %36 = vector.load %arg13[%c0_29, %c0_30, %c0_31] : memref<2x8x16xf32, #tpu.memory_space<vmem>>, vector<2x8x16xf32>
    tpu.vector_store %arg13[%c0_29, %c0_30, %c0_31], %35 {strides = array<i32>} : memref<2x8x16xf32, #tpu.memory_space<vmem>>, vector<2x8x16xf32>,
    %c0_32 = arith.constant 0 : index
    %c0_33 = arith.constant 0 : index
    %c0_34 = arith.constant 0 : index
    %37 = vector.load %arg11[%c0_32, %c0_33, %c0_34] : memref<2x8x1xf32, #tpu.memory_space<vmem>>, vector<2x8x1xf32>
    tpu.vector_store %arg11[%c0_32, %c0_33, %c0_34], %18 {strides = array<i32>} : memref<2x8x1xf32, #tpu.memory_space<vmem>>, vector<2x8x1xf32>,
    %c0_i32_35 = arith.constant 0 : i32
    %38 = arith.cmpi eq, %arg2, %c0_i32_35 : i32
    %39 = arith.extui %38 : i1 to i32
    %c0_i32_36 = arith.constant 0 : i32
    %40 = arith.cmpi ne, %39, %c0_i32_36 : i32
    scf.if %40 {
      %c0_37 = arith.constant 0 : index
      %c0_38 = arith.constant 0 : index
      %c0_39 = arith.constant 0 : index
      %41 = vector.load %arg12[%c0_37, %c0_38, %c0_39] : memref<2x8x1xf32, #tpu.memory_space<vmem>>, vector<2x8x1xf32>
      %42 = tpu.reciprocal %41 {approx = true} : vector<2x8x1xf32> -> vector<2x8x1xf32>
      %c0_40 = arith.constant 0 : index
      %c0_41 = arith.constant 0 : index
      %c0_42 = arith.constant 0 : index
      %43 = vector.load %arg13[%c0_40, %c0_41, %c0_42] : memref<2x8x16xf32, #tpu.memory_space<vmem>>, vector<2x8x16xf32>
      %44 = vector.broadcast %42 : vector<2x8x1xf32> to vector<2x8x16xf32>
      %45 = arith.mulf %43, %44 : vector<2x8x16xf32>
      %46 = arith.truncf %45 : vector<2x8x16xf32> to vector<2x8x16xbf16>
      %c0_43 = arith.constant 0 : index
      %c0_44 = arith.constant 0 : index
      %47 = vector.load %arg8[%c0_43, %c0_44] : memref<1x32xf32, #tpu.memory_space<vmem>>, vector<1x32xf32>
      %48 = vector.extract_strided_slice %46 {offsets = [0, 0, 0], sizes = [1, 8, 16], strides = [1, 1, 1]} : vector<2x8x16xbf16> to vector<1x8x16xbf16>
      %49 = vector.shape_cast %48 : vector<1x8x16xbf16> to vector<8x16xbf16>
      %c0_45 = arith.constant 0 : index
      %c0_46 = arith.constant 0 : index
      %c0_47 = arith.constant 0 : index
      %50 = vector.load %arg7[%c0_45, %c0_46, %c0_47] : memref<2x16x32xbf16, #tpu.memory_space<vmem>>, vector<1x16x32xbf16>
      %51 = vector.shape_cast %50 : vector<1x16x32xbf16> to vector<16x32xbf16>
      %cst_48 = arith.constant dense<0.000000e+00> : vector<8x32xf32>
      %52 = tpu.matmul %49, %51, %cst_48 {dimension_numbers = #tpu.dot_dimension_numbers<[1], [0], [0], [1], [0, 0, 1, 1], [], []>} : vector<8x16xbf16>, vector<16x32xbf16>, vector<8x32xf32> -> vector<8x32xf32>
      %53 = vector.broadcast %47 : vector<1x32xf32> to vector<8x32xf32>
      %54 = arith.addf %53, %52 : vector<8x32xf32>
      %55 = vector.extract_strided_slice %46 {offsets = [1, 0, 0], sizes = [1, 8, 16], strides = [1, 1, 1]} : vector<2x8x16xbf16> to vector<1x8x16xbf16>
      %56 = vector.shape_cast %55 : vector<1x8x16xbf16> to vector<8x16xbf16>
      %c1 = arith.constant 1 : index
      %c0_49 = arith.constant 0 : index
      %c0_50 = arith.constant 0 : index
      %57 = vector.load %arg7[%c1, %c0_49, %c0_50] : memref<2x16x32xbf16, #tpu.memory_space<vmem>>, vector<1x16x32xbf16>
      %58 = vector.shape_cast %57 : vector<1x16x32xbf16> to vector<16x32xbf16>
      %cst_51 = arith.constant dense<0.000000e+00> : vector<8x32xf32>
      %59 = tpu.matmul %56, %58, %cst_51 {dimension_numbers = #tpu.dot_dimension_numbers<[1], [0], [0], [1], [0, 0, 1, 1], [], []>} : vector<8x16xbf16>, vector<16x32xbf16>, vector<8x32xf32> -> vector<8x32xf32>
      %60 = arith.addf %54, %59 : vector<8x32xf32>
      %c0_52 = arith.constant 0 : index
      %c0_53 = arith.constant 0 : index
      %c0_54 = arith.constant 0 : index
      %61 = vector.load %arg9[%c0_52, %c0_53, %c0_54] : memref<1x8x32xf32, #tpu.memory_space<vmem>>, vector<1x8x32xf32>
      %62 = vector.shape_cast %61 : vector<1x8x32xf32> to vector<8x32xf32>
      %63 = vector.shape_cast %60 : vector<8x32xf32> to vector<1x8x32xf32>
      tpu.vector_store %arg9[%c0_52, %c0_53, %c0_54], %63 {strides = array<i32>} : memref<1x8x32xf32, #tpu.memory_space<vmem>>, vector<1x8x32xf32>,
    } else {
    }
    return
  }
  func.func @transform_0(%arg0: i32, %arg1: i32, %arg2: i32) -> (i32, i32, i32, i32) {
    %c0_i32 = arith.constant 0 : i32
    %c0_i32_0 = arith.constant 0 : i32
    %c0_i32_1 = arith.constant 0 : i32
    return %arg0, %c0_i32, %arg1, %c0_i32_0 : i32, i32, i32, i32
  }
  func.func @transform_1(%arg0: i32, %arg1: i32, %arg2: i32) -> (i32, i32, i32, i32) {
    %c0_i32 = arith.constant 0 : i32
    %c0_i32_0 = arith.constant 0 : i32
    %c0_i32_1 = arith.constant 0 : i32
    return %arg0, %c0_i32, %arg2, %c0_i32_0 : i32, i32, i32, i32
  }
  func.func @transform_2(%arg0: i32, %arg1: i32, %arg2: i32) -> (i32, i32, i32, i32) {
    %c0_i32 = arith.constant 0 : i32
    %c0_i32_0 = arith.constant 0 : i32
    %c0_i32_1 = arith.constant 0 : i32
    return %arg0, %c0_i32, %arg2, %c0_i32_0 : i32, i32, i32, i32
  }
  func.func @transform_3(%arg0: i32, %arg1: i32, %arg2: i32) -> (i32, i32, i32) {
    %c0_i32 = arith.constant 0 : i32
    return %arg0, %arg1, %arg2 : i32, i32, i32
  }
  func.func @transform_4(%arg0: i32, %arg1: i32, %arg2: i32) -> (i32, i32, i32) {
    %c0_i32 = arith.constant 0 : i32
    %c0_i32_0 = arith.constant 0 : i32
    %c0_i32_1 = arith.constant 0 : i32
    %c0_i32_2 = arith.constant 0 : i32
    return %c0_i32, %c0_i32_0, %c0_i32_1 : i32, i32, i32
  }
  func.func @transform_5(%arg0: i32, %arg1: i32, %arg2: i32) -> (i32, i32) {
    %c0_i32 = arith.constant 0 : i32
    %c0_i32_0 = arith.constant 0 : i32
    %c0_i32_1 = arith.constant 0 : i32
    return %c0_i32, %c0_i32_0 : i32, i32
  }
  func.func @transform_6(%arg0: i32, %arg1: i32, %arg2: i32) -> (i32, i32, i32) {
    %c0_i32 = arith.constant 0 : i32
    %c0_i32_0 = arith.constant 0 : i32
    return %arg0, %arg1, %c0_i32 : i32, i32, i32
  }
}

</mosaic_0001>

<bundles_post_ra>
// kernel: tpu_custom_call.1
= control target key start
LH: loop header
LB: loop body
LE: loop exit
PB: predicated region body
PF: predicated region fallthrough
CT: control target
= control target key end

     0   :  { %11 = vsyncpa [#allocation7], 0  ;;  %s1749_s0 = inlined_call_operand.vmem [shape: f32[2,2,8,16], index: 0, kind: input, shape index: {}]   ;;  %s1750_s1 = inlined_call_operand.vmem [shape: f32[2,2,128,16], index: 1, kind: input, shape index: {}]   ;;  %s1751_s2 = inlined_call_operand.vmem [shape: f32[2,2,128,16], index: 2, kind: input, shape index: {}]   ;;  %s1752_s3 = inlined_call_operand.vmem [shape: bf16[2,8,128], index: 3, kind: input, shape index: {}]   ;;  %s1753_s4 = inlined_call_operand.vmem [shape: bf16[2,16,32], index: 4, kind: input, shape index: {}]   ;;  %s1754_s5 = inlined_call_operand.vmem [shape: f32[1,32], index: 5, kind: input, shape index: {}]   ;;  %s1755_s6 = inlined_call_operand.hbm [shape: f32[2,8,32], index: 6, kind: output, shape index: {}]  }
   0x1   :  { %13 = vsyncpa [#allocation7 + $0x1], 0  ;;  %s1436_s21 = smov 0   ;;  %s1438_s22 = smov 0  }
   0x2   :  { %s1440_s23 = smov 0   ;;  %s1442_s24 = smov 0  }
   0x3   :  { %s1444_s25 = smov 0   ;;  %s1446_s26 = smov 0  }
   0x4 LB: > { %s1078_s27 = sadd.s32 4294967295, %s1394_s26   ;;  %s1079_s28 = sadd.s32 4294967294, %s1394_s26   ;;  %s1394_s26 = sphi %s1446_s26, %s19_s26   ;;  %s1390_s25 = sphi %s1444_s25, %s1762_s25   ;;  %s1386_s24 = sphi %s1442_s24, %s1761_s24   ;;  %s1382_s23 = sphi %s1440_s23, %s1760_s23   ;;  %s1378_s22 = sphi %s1438_s22, %s1759_s22   ;;  %s1374_s21 = sphi %s1436_s21, %s1758_s21  }
   0x5   : > { %s38_s29 = sadd.s32 1, %s1390_s25  ;;  %s203_s30 = sadd.s32 1, %s1382_s23 }
   0x6   : > { %p40_p0 = scmp.ge.s32.totalorder %s38_s29, 2  ;;  %p213_p1 = scmp.ne.s32.totalorder %s1382_s23, %s1378_s22 }
   0x7   : > { %p214_p2 = scmp.eq.s32.totalorder %s1078_s27, 1  ;;  %p219_p3 = scmp.ne.s32.totalorder %s1378_s22, %s1374_s21 }
   0x8   : > { %s1764_s29 = smov (%p40_p0, %s38_s29), 0  ;;  %p220_p5 = scmp.eq.s32.totalorder %s1079_s28, 1 }
   0x9   : > { %p1476_p4 = por %p214_p2, %p213_p1  ;;  %s198_s8 = ssub.s32 %s1390_s25, %s1764_s29 }
   0xa   : > { %p1082_p6 = scmp.ge.s32.totalorder %s1394_s26, 1  ;;  %p201_p7 = scmp.eq.s32.totalorder %s198_s8, 0 }
   0xb   : > { %p1483_p8 = por %p220_p5, %p219_p3  ;;  %p294_p9 = scmp.lt.s32.totalorder %s1394_s26, 3 }
   0xc   : > { %s1489_s10 = scalar_select %p201_p7, %s1382_s23, %s203_s30  }
   0xd   : > { %p295_p10 = pnand %p1082_p6, %p294_p9 }
   0xe   : > { %p355_p11 = scmp.lt.s32.totalorder (!%p295_p10), %s1386_s24, 1  ;;  %vm412_vm0 = vcmask (!%p295_p10), 130048   ;;  %v1396_v0 = vmov (!%p295_p10), 0.0   ;;  %vm1397_vm1 = vmmov (!%p295_p10), 0   ;;  %vm404_vm2 = vcmask (!%p295_p10), 125952   ;;  %s352_s17 = sand.u32 (!%p295_p10), 1, %s1378_s22  }
   0xf   : > { %298 = sbr.rel (%p295_p10) target bundleno = 1121 (0x461), region = 44  ;;  %1147 = vmatprep.subr.bf16.mxu0 (!%p295_p10), %v1396_v0  ;;  %413 = vst.msk [vmem:[#allocation5] sm:$0xff] (!%p295_p10), %vm412_vm0, %v1396_v0  ;;  %414 = vst.msk [vmem:[#allocation5 + $0x8] sm:$0xff] (!%p295_p10), %vm412_vm0, %v1396_v0  ;;  %1167 = vmatprep.subr.bf16.mxu1 (!%p295_p10), %v1396_v0  ;;  %vm407_vm3 = vcmask (!%p295_p10), 7168   ;;  %s1083_s18 = sshll.u32 (!%p295_p10), %s352_s17, 3  ;;  %vm930_vm4 = vcmask (!%p295_p10), 261120  }
  0x10   : > { %1163 = vmatprep.mubr.msk.bf16.mxu0 (!%p295_p10), %vm1397_vm1, %v1396_v0  ;;  %1183 = vmatprep.mubr.msk.bf16.mxu1 (!%p295_p10), %vm1397_vm1, %v1396_v0  ;;  %410 = vst.msk [vmem:[#allocation4] sm:$0xff] (!%p295_p10), %vm407_vm3, %v1396_v0  ;;  %411 = vst.msk [vmem:[#allocation4 + $0x8] sm:$0xff] (!%p295_p10), %vm407_vm3, %v1396_v0  ;;  %s1101_s27 = sshll.u32 (!%p295_p10), %s1386_s24, 7  ;;  %s354_s28 = scalar_lea.vmem (!%p295_p10), [#allocation6], %s1083_s18 }
  0x16   : > { %s1499_s11 = scalar_select %p355_p11, %s1386_s24, 1 }
  0x17   : > { %s933_s24 = scalar_lea.sflag [#allocation7], %s352_s17 }
  0x18   : > { %s1105_s12 = sshll.u32 %s1499_s11, 8  ;;  %s1104_s16 = sshll.u32 %s1499_s11, 4 }
  0x19   : > { %s1511_s15 = scalar_lea.vmem %s1750_s1, %s1105_s12  ;;  %s362_s19 = scalar_lea.vmem %s1749_s0, %s1104_s16 }
  0x1a   : > { %v415_v1 = vld [vmem:[%s1511_s15] sm:$0xff]  ;;  %v416_v2 = vld [vmem:[%s1511_s15 + $0x8] sm:$0xff]  ;;  %v417_v7 = vld [vmem:[%s1511_s15 + $0x10] sm:$0xff]  ;;  %s1090_s20 = sshll.u32 %s1499_s11, 2  ;;  %s1608_s14 = scalar_lea.vmem %s1751_s2, %s1105_s12 }
  0x1b   : > { %v431_v3 = vld [vmem:[%s1511_s15 + $0x80] sm:$0xff]  ;;  %v447_v4 = vpack.c.bf16 %v416_v2, %v415_v1  ;;  %v432_v5 = vld [vmem:[%s1511_s15 + $0x88] sm:$0xff]  ;;  %v418_v8 = vld [vmem:[%s1511_s15 + $0x18] sm:$0xff]  ;;  %s392_s30 = scalar_lea.vmem %s1752_s3, %s1090_s20  ;;  %s1400_s12 = smov [#allocation6]  }
  0x1c   : > { %v455_v6 = vpack.c.bf16 %v432_v5, %v431_v3  ;;  %v433_v10 = vld [vmem:[%s1511_s15 + $0x90] sm:$0xff]  ;;  %v434_v11 = vld [vmem:[%s1511_s15 + $0x98] sm:$0xff]  ;;  %v448_v13 = vpack.c.bf16 %v418_v8, %v417_v7  ;;  %v419_v17 = vld [vmem:[%s1511_s15 + $0x20] sm:$0xff] }
  0x1d   : > { %v520_v9 = vsel %vm412_vm0, %v447_v4, 0  ;;  %v456_v14 = vpack.c.bf16 %v434_v11, %v433_v10  ;;  %v420_v18 = vld [vmem:[%s1511_s15 + $0x28] sm:$0xff]  ;;  %v398_v19 = vld [vmem:[%s362_s19] sm:$0xff]  ;;  %v421_v31 = vld [vmem:[%s1511_s15 + $0x30] sm:$0xff]  ;;  %v1398_v10 = vmov -inf  }
  0x1e   : > { %1148 = vmatpush3.bf16.xpose.msra.mxu0 %v520_v9  ;;  %v587_v12 = vsel %vm412_vm0, %v455_v6, 0  ;;  %v523_v15 = vsel %vm412_vm0, %v448_v13, 0  ;;  %v435_v20 = vld [vmem:[%s1511_s15 + $0xa0] sm:$0xff]  ;;  %v436_v21 = vld [vmem:[%s1511_s15 + $0xa8] sm:$0xff]  ;;  %v400_v22 = vmul.f32 0.17677669, %v398_v19  ;;  %v449_v25 = vpack.c.bf16 %v420_v18, %v419_v17 }
  0x1f   : > { %1168 = vmatpush3.bf16.xpose.msra.mxu1 %v587_v12  ;;  %1149 = vmatprep.subr.bf16.mxu0 %v1396_v0  ;;  %v590_v16 = vsel %vm412_vm0, %v456_v14, 0  ;;  %v399_v23 = vld [vmem:[%s362_s19 + $0x8] sm:$0xff]  ;;  %v457_v27 = vpack.c.bf16 %v436_v21, %v435_v20  ;;  %v422_v32 = vld [vmem:[%s1511_s15 + $0x38] sm:$0xff]  ;;  %v437_v33 = vld [vmem:[%s1511_s15 + $0xb0] sm:$0xff]  ;;  %408 = vst.msk [vmem:[#allocation3] sm:$0xff] %vm407_vm3, %v1398_v10 }
  0x20   : > { %1169 = vmatprep.subr.bf16.mxu1 %v1396_v0  ;;  %v401_v24 = vmul.f32 0.17677669, %v399_v23  ;;  %v402_v26 = vpack.c.bf16 %v400_v22, %v400_v22  ;;  %v526_v29 = vsel %vm412_vm0, %v449_v25, 0  ;;  %v438_v34 = vld [vmem:[%s1511_s15 + $0xb8] sm:$0xff]  ;;  %v450_v35 = vpack.c.bf16 %v422_v32, %v421_v31  ;;  %v423_v39 = vld [vmem:[%s1511_s15 + $0x40] sm:$0xff]  ;;  %v424_v40 = vld [vmem:[%s1511_s15 + $0x48] sm:$0xff] }
  0x21   : > { %v593_v30 = vsel %vm412_vm0, %v457_v27, 0  ;;  %v458_v36 = vpack.c.bf16 %v438_v34, %v437_v33  ;;  %v439_v41 = vld [vmem:[%s1511_s15 + $0xc0] sm:$0xff]  ;;  %v440_v42 = vld [vmem:[%s1511_s15 + $0xc8] sm:$0xff]  ;;  %v451_v43 = vpack.c.bf16 %v424_v40, %v423_v39  ;;  %v425_v47 = vld [vmem:[%s1511_s15 + $0x50] sm:$0xff]  ;;  %409 = vst.msk [vmem:[#allocation3 + $0x8] sm:$0xff] %vm407_vm3, %v1398_v10  ;;  %v1399_v23 = vmov 0  }
  0x22   : > { %v403_v28 = vpack.c.bf16 %v401_v24, %v401_v24  ;;  %405 = vst.msk [vmem:[#allocation2] sm:$0xf] %vm404_vm2, %v402_v26  ;;  %v529_v37 = vsel %vm412_vm0, %v450_v35, 0  ;;  %v459_v44 = vpack.c.bf16 %v440_v42, %v439_v41  ;;  %v426_v48 = vld [vmem:[%s1511_s15 + $0x58] sm:$0xff]  ;;  %v441_v49 = vld [vmem:[%s1511_s15 + $0xd0] sm:$0xff]  ;;  %v427_v55 = vld [vmem:[%s1511_s15 + $0x60] sm:$0xff]  ;;  %1300 = vset.pattern.permute.xlu1 %v1399_v23  ;;  %1301 = vset.pattern.permute.xlu0 %v1399_v23 }
  0x23   : > { %v596_v38 = vsel %vm412_vm0, %v458_v36, 0  ;;  %v532_v45 = vsel %vm412_vm0, %v451_v43, 0  ;;  %v442_v50 = vld [vmem:[%s1511_s15 + $0xd8] sm:$0xff]  ;;  %v452_v51 = vpack.c.bf16 %v426_v48, %v425_v47  ;;  %v428_v56 = vld [vmem:[%s1511_s15 + $0x68] sm:$0xff]  ;;  %v443_v57 = vld [vmem:[%s1511_s15 + $0xe0] sm:$0xff] }
  0x24   : > { %406 = vst.msk [vmem:[#allocation2 + $0x4] sm:$0xf] %vm404_vm2, %v403_v28  ;;  %v599_v46 = vsel %vm412_vm0, %v459_v44, 0  ;;  %v460_v52 = vpack.c.bf16 %v442_v50, %v441_v49  ;;  %v444_v58 = vld [vmem:[%s1511_s15 + $0xe8] sm:$0xff]  ;;  %v453_v59 = vpack.c.bf16 %v428_v56, %v427_v55  ;;  %v429_v63 = vld [vmem:[%s1511_s15 + $0x70] sm:$0xff]  ;;  %v430_v1 = vld [vmem:[%s1511_s15 + $0x78] sm:$0xff] }
  0x25   : > { %v535_v53 = vsel %vm412_vm0, %v452_v51, 0  ;;  %v461_v60 = vpack.c.bf16 %v444_v58, %v443_v57  ;;  %v445_v2 = vld [vmem:[%s1511_s15 + $0xf0] sm:$0xff]  ;;  %v446_v3 = vld [vmem:[%s1511_s15 + $0xf8] sm:$0xff]  ;;  %v454_v4 = vpack.c.bf16 %v430_v1, %v429_v63  ;;  %v513_v11 = vld [vmem:[%s392_s30] sm:$0xf]  ;;  %s947_s30 = sshll.u32 %s354_s28, 4  ;;  %s1704_s30 = int_to_ptr.vmem [resolvable:$true] %s947_s30 }
  0x26   : > { %1150 = vmatpush3.bf16.xpose.msra.mxu0 %v523_v15  ;;  %v602_v54 = vsel %vm412_vm0, %v460_v52, 0  ;;  %v538_v61 = vsel %vm412_vm0, %v453_v59, 0  ;;  %v462_v5 = vpack.c.bf16 %v446_v3, %v445_v2  ;;  %v514_v12 = vunpack.c.l.bf16 %v513_v11  ;;  %v463_v24 = vld [vmem:[%s1608_s14] sm:$0xff]  ;;  %v464_v25 = vld [vmem:[%s1608_s14 + $0x8] sm:$0xff]  ;;  %v465_v26 = vld [vmem:[%s1608_s14 + $0x10] sm:$0xff]  ;;  %s1316_s11 = scalar_lea.vmem %s1704_s30, 128 }
  0x27   : > { %1170 = vmatpush3.bf16.xpose.msra.mxu1 %v590_v16  ;;  %1151 = vmatprep.subr.bf16.mxu0 %v1396_v0  ;;  %v605_v62 = vsel %vm412_vm0, %v461_v60, 0  ;;  %v541_v6 = vsel %vm412_vm0, %v454_v4, 0  ;;  %v495_v27 = vpack.c.bf16 %v464_v25, %v463_v24  ;;  %v466_v28 = vld [vmem:[%s1608_s14 + $0x18] sm:$0xff]  ;;  %v481_v32 = vld [vmem:[%s1608_s14 + $0x90] sm:$0xff]  ;;  %v467_v35 = vld [vmem:[%s1608_s14 + $0x20] sm:$0xff]  ;;  %p1317_p12 = scmp.ne.s32.totalorder %s1704_s30, %s1316_s11  ;;  %s1320_s15 = sshll.u32 %s1400_s12, 4  ;;  %s1321_s15 = int_to_ptr.vmem [resolvable:$false] %s1320_s15 }
  0x28   : > { %1171 = vmatprep.subr.bf16.mxu1 %v1396_v0  ;;  %v608_v7 = vsel %vm412_vm0, %v462_v5, 0  ;;  %v496_v33 = vpack.c.bf16 %v466_v28, %v465_v26  ;;  %v482_v34 = vld [vmem:[%s1608_s14 + $0x98] sm:$0xff]  ;;  %v468_v36 = vld [vmem:[%s1608_s14 + $0x28] sm:$0xff]  ;;  %v469_v41 = vld [vmem:[%s1608_s14 + $0x30] sm:$0xff]  ;;  %s1322_s16 = scalar_lea.vmem %s1321_s15, 256  ;;  %p1323_p1 = scmp.lt.s32.totalorder %s1704_s30, %s1321_s15 }
  0x29   : > { %v511_v8 = vld [vmem:[#allocation2] sm:$0xf]  ;;  %v484_v39 = vld [vmem:[%s1608_s14 + $0xa8] sm:$0xff]  ;;  %v497_v40 = vpack.c.bf16 %v468_v36, %v467_v35  ;;  %v470_v42 = vld [vmem:[%s1608_s14 + $0x38] sm:$0xff]  ;;  %p1318_p13 = pnand %p1317_p12, %p1476_p4  ;;  %p1324_p2 = scmp.lt.s32.totalorder %s1322_s16, %s1316_s11 }
  0x2a   : > { %v498_v44 = vpack.c.bf16 %v470_v42, %v469_v41  ;;  %v1636_v48 = vld [vmem:[#allocation3 + $0x8] sm:$0xff]  ;;  %v471_v49 = vld [vmem:[%s1608_s14 + $0x40] sm:$0xff]  ;;  %v472_v50 = vld [vmem:[%s1608_s14 + $0x48] sm:$0xff] }
  0x2b   : > { %v512_v9 = vld [vmem:[#allocation2 + $0x4] sm:$0xf]  ;;  %v485_v51 = vld [vmem:[%s1608_s14 + $0xb0] sm:$0xff]  ;;  %v474_v59 = vld [vmem:[%s1608_s14 + $0x58] sm:$0xff]  ;;  %p1319_p0 = pneg %p1318_p13  ;;  %p1325_p3 = por %p1324_p2, %p1323_p1 }
  0x2c   : > { %v473_v58 = vld [vmem:[%s1608_s14 + $0x50] sm:$0xff]  ;;  %v487_v60 = vld [vmem:[%s1608_s14 + $0xc0] sm:$0xff]  ;;  %v488_v63 = vld [vmem:[%s1608_s14 + $0xc8] sm:$0xff] }
  0x2d   : > { %v507_v1 = vpack.c.bf16 %v488_v63, %v487_v60  ;;  %v475_v2 = vld [vmem:[%s1608_s14 + $0x60] sm:$0xff]  ;;  %v476_v3 = vld [vmem:[%s1608_s14 + $0x68] sm:$0xff]  ;;  %v489_v4 = vld [vmem:[%s1608_s14 + $0xd0] sm:$0xff]  ;;  %p1326_p5 = pnand %p1325_p3, %p1319_p0 }
  0x2e   : > { %1152 = vmatpush3.bf16.xpose.msra.mxu0 %v526_v29  ;;  %v479_v29 = vld [vmem:[%s1608_s14 + $0x80] sm:$0xff]  ;;  %v501_v5 = vpack.c.bf16 %v476_v3, %v475_v2  ;;  %v492_v11 = vld [vmem:[%s1608_s14 + $0xe8] sm:$0xff] }
  0x2f   : > { %1172 = vmatpush3.bf16.xpose.msra.mxu1 %v593_v30  ;;  %1153 = vmatprep.subr.bf16.mxu0 %v1396_v0  ;;  %v480_v30 = vld [vmem:[%s1608_s14 + $0x88] sm:$0xff]  ;;  %v491_v10 = vld [vmem:[%s1608_s14 + $0xe0] sm:$0xff] }
  0x30   : > { %1173 = vmatprep.subr.bf16.mxu1 %v1396_v0  ;;  %v503_v31 = vpack.c.bf16 %v480_v30, %v479_v29  ;;  %v681_v35 = vld [vmem:[#allocation4 + $0x8] sm:$0xff]  ;;  %v1303_v42 = vld [vmem:[%s1753_s4 + $0x8] sm:$0xff]  }
  0x36   : > { %1154 = vmatpush3.bf16.xpose.msra.mxu0 %v529_v37  ;;  %v504_v37 = vpack.c.bf16 %v482_v34, %v481_v32  ;;  %v680_v32 = vld [vmem:[#allocation4] sm:$0xff] }
  0x37   : > { %1174 = vmatpush3.bf16.xpose.msra.mxu1 %v596_v38  ;;  %1155 = vmatprep.subr.bf16.mxu0 %v1396_v0  ;;  %v483_v38 = vld [vmem:[%s1608_s14 + $0xa0] sm:$0xff] }
  0x38   : > { %1175 = vmatprep.subr.bf16.mxu1 %v1396_v0  ;;  %v505_v43 = vpack.c.bf16 %v484_v39, %v483_v38 }
  0x3e   : > { %1156 = vmatpush3.bf16.xpose.msra.mxu0 %v532_v45  ;;  %v1631_v45 = vld [vmem:[#allocation3] sm:$0xff] }
  0x3f   : > { %1176 = vmatpush3.bf16.xpose.msra.mxu1 %v599_v46  ;;  %1157 = vmatprep.subr.bf16.mxu0 %v1396_v0 }
  0x40   : > { %1177 = vmatprep.subr.bf16.mxu1 %v1396_v0 }
  0x46   : > { %1158 = vmatpush3.bf16.xpose.msra.mxu0 %v535_v53  ;;  %v499_v53 = vpack.c.bf16 %v472_v50, %v471_v49 }
  0x47   : > { %1178 = vmatpush3.bf16.xpose.msra.mxu1 %v602_v54  ;;  %1159 = vmatprep.subr.bf16.mxu0 %v1396_v0  ;;  %v486_v54 = vld [vmem:[%s1608_s14 + $0xb8] sm:$0xff] }
  0x48   : > { %1179 = vmatprep.subr.bf16.mxu1 %v1396_v0  ;;  %v506_v56 = vpack.c.bf16 %v486_v54, %v485_v51 }
  0x4e   : > { %1160 = vmatpush3.bf16.xpose.msra.mxu0 %v538_v61 }
  0x4f   : > { %1180 = vmatpush3.bf16.xpose.msra.mxu1 %v605_v62  ;;  %1161 = vmatprep.subr.bf16.mxu0 %v1396_v0  ;;  %v500_v62 = vpack.c.bf16 %v474_v59, %v473_v58 }
  0x50   : > { %1181 = vmatprep.subr.bf16.mxu1 %v1396_v0 }
  0x56   : > { %1162 = vmatpush3.bf16.xpose.msra.mxu0 %v541_v6  ;;  %v490_v6 = vld [vmem:[%s1608_s14 + $0xd8] sm:$0xff] }
  0x57   : > { %1182 = vmatpush3.bf16.xpose.msra.mxu1 %v608_v7  ;;  %1187 = vmatprep.subr.bf16.mxu0 %v1396_v0  ;;  %v477_v7 = vld [vmem:[%s1608_s14 + $0x70] sm:$0xff] }
  0x58   : > { %1207 = vmatprep.subr.bf16.mxu1 %v1396_v0 }
  0x5d   : > { %1164 = vmatmul.mubr.msk.bf16.vlgmr.msra.gmra.mrb[0].mxu0 %vm412_vm0, %v511_v8  ;;  %v478_v8 = vld [vmem:[%s1608_s14 + $0x78] sm:$0xff] }
  0x5e   : > { %1184 = vmatmul.mubr.msk.bf16.vlgmr.msra.gmra.mrb[0].mxu1 %vm412_vm0, %v512_v9  ;;  %1203 = vmatprep.mubr.msk.bf16.mxu0 %vm1397_vm1, %v1396_v0  ;;  %v508_v9 = vpack.c.bf16 %v490_v6, %v489_v4 }
  0x5f   : > { %1223 = vmatprep.mubr.msk.bf16.mxu1 %vm1397_vm1, %v1396_v0  ;;  %1188 = vmatpush3.bf16.msra.mxu0 %v495_v27 }
  0x60   : > { %1189 = vmatprep.subr.bf16.mxu0 %v1396_v0  ;;  %1208 = vmatpush3.bf16.msra.mxu1 %v503_v31  ;;  %v1302_v31 = vld [vmem:[%s1753_s4] sm:$0xff]  }
  0x61   : > { %1209 = vmatprep.subr.bf16.mxu1 %v1396_v0 }
  0x63   : > { %1190 = vmatpush3.bf16.msra.mxu0 %v496_v33 }
  0x64   : > { %1191 = vmatprep.subr.bf16.mxu0 %v1396_v0  ;;  %1210 = vmatpush3.bf16.msra.mxu1 %v504_v37 }
  0x65   : > { %1211 = vmatprep.subr.bf16.mxu1 %v1396_v0 }
  0x67   : > { %1192 = vmatpush3.bf16.msra.mxu0 %v497_v40 }
  0x68   : > { %1193 = vmatprep.subr.bf16.mxu0 %v1396_v0  ;;  %1212 = vmatpush3.bf16.msra.mxu1 %v505_v43 }
  0x69   : > { %1213 = vmatprep.subr.bf16.mxu1 %v1396_v0 }
  0x6b   : > { %1194 = vmatpush3.bf16.msra.mxu0 %v498_v44  ;;  %v693_v44 = vld [vmem:[#allocation5] sm:$0xff] }
  0x6c   : > { %1195 = vmatprep.subr.bf16.mxu0 %v1396_v0  ;;  %1214 = vmatpush3.bf16.msra.mxu1 %v506_v56 }
  0x6d   : > { %1215 = vmatprep.subr.bf16.mxu1 %v1396_v0 }
  0x6f   : > { %1196 = vmatpush3.bf16.msra.mxu0 %v499_v53 }
  0x70   : > { %1197 = vmatprep.subr.bf16.mxu0 %v1396_v0  ;;  %1216 = vmatpush3.bf16.msra.mxu1 %v507_v1 }
  0x71   : > { %1217 = vmatprep.subr.bf16.mxu1 %v1396_v0 }
  0x73   : > { %1198 = vmatpush3.bf16.msra.mxu0 %v500_v62 }
  0x74   : > { %1199 = vmatprep.subr.bf16.mxu0 %v1396_v0  ;;  %1218 = vmatpush3.bf16.msra.mxu1 %v508_v9 }
  0x75   : > { %1219 = vmatprep.subr.bf16.mxu1 %v1396_v0 }
  0x77   : > { %1200 = vmatpush3.bf16.msra.mxu0 %v501_v5  ;;  %v1095_v5 = vld [vmem:[%s1754_s5] ss:$0 sm:$0xff] }
  0x78   : > { %1201 = vmatprep.subr.bf16.mxu0 %v1396_v0 }
 0x130   : > { %v577_v13 = vpop.f32.mrb[0].mxu0 }
 0x131   : > { %v1597_v14 = vadd.f32 %v577_v13, %v514_v12  ;;  %v1165_v15 = vpop.f32.mrb[1].mxu0  ;;  %v644_v16 = vpop.f32.mrb[0].mxu1  ;;  %v509_v13 = vpack.c.bf16 %v492_v11, %v491_v10 }
 0x132   : > { %v1599_v17 = vadd.f32 %v644_v16, %v514_v12  ;;  %v580_v18 = vpop.f32.mrb[2].mxu0  ;;  %v1185_v19 = vpop.f32.mrb[1].mxu1  ;;  %v502_v12 = vpack.c.bf16 %v478_v8, %v477_v7  ;;  %v493_v15 = vld [vmem:[%s1608_s14 + $0xf0] sm:$0xff]  ;;  %v494_v16 = vld [vmem:[%s1608_s14 + $0xf8] sm:$0xff]  ;;  %s1702_s14 = scalar_lea.hbm %s1755_s6, %s1101_s27 }
 0x133   : > { %v647_v20 = vpop.f32.mrb[2].mxu1  ;;  %652 = vmax.xlane.f32.xlu0 %v1597_v14  ;;  %v1166_v21 = vpop.f32.mrb[3].mxu0  ;;  %1220 = vmatpush3.bf16.msra.mxu1 %v509_v13  ;;  %v510_v18 = vpack.c.bf16 %v494_v16, %v493_v15 }
 0x134   : > { %v1186_v22 = vpop.f32.mrb[3].mxu1  ;;  %1202 = vmatpush3.bf16.msra.mxu0 %v502_v12  ;;  %1221 = vmatprep.subr.bf16.mxu1 %v1396_v0 }
 0x135   : > { %1233 = vmatprep.subr.bf16.mxu0 %v1396_v0 }
 0x137   : > { %654 = vmax.xlane.f32.xlu0 %v1599_v17  ;;  %1222 = vmatpush3.bf16.msra.mxu1 %v510_v18 }
 0x138   : > { %1227 = vmatprep.subr.bf16.mxu1 %v1396_v0 }
 0x1c0   : > { %v653_v46 = vpop.xlane.xlu0 %652 }
 0x1c1   : > { %v1634_v47 = vmax.f32 %v1631_v45, %v653_v46 }
 0x1c3   : > { %v658_v52 = vsub.f32 %v1631_v45, %v1634_v47  ;;  %793 = vst.msk [vmem:[#allocation3] sm:$0xff] %vm407_vm3, %v1634_v47  ;;  %666 = vperm.xlu1 %1300, %v1634_v47   ;;  %v694_v47 = vld [vmem:[#allocation5 + $0x8] sm:$0xff] }
 0x1c4   : > { %v655_v55 = vpop.xlane.xlu0 %654 }
 0x1c5   : > { %v657_v57 = vmax.f32 %v1636_v48, %v655_v55 }
 0x1c7   : > { %v659_v61 = vsub.f32 %v1636_v48, %v657_v57  ;;  %794 = vst.msk [vmem:[#allocation3 + $0x8] sm:$0xff] %vm407_vm3, %v657_v57  ;;  %671 = vperm.xlu1 %1300, %v657_v57  }
 0x1c9   : > { %v662_v29 = vmul.f32 1.442695, %v659_v61 }
 0x242   : > { %v667_v19 = vpop.permute.xlu1 %666 }
 0x243   : > { %v674_v20 = vsub.f32 %v1597_v14, %v667_v19  ;;  %v660_v14 = vmul.f32 1.442695, %v658_v52 }
 0x245   : > { %v676_v21 = vmul.f32 1.442695, %v674_v20 }
 0x246   : > { %v672_v22 = vpop.permute.xlu1 %671 }
 0x247   : > { %1304 = vpow2.f32 %v676_v21  ;;  %v675_v23 = vsub.f32 %v1599_v17, %v672_v22 }
 0x249   : > { %v678_v24 = vmul.f32 1.442695, %v675_v23 }
 0x24b   : > { %1306 = vpow2.f32 %v678_v24 }
 0x24c   : > { %1308 = vpow2.f32 %v662_v29 }
 0x24d   : > { %1310 = vpow2.f32 %v660_v14 }
 0x251   : > { %v1305_v25 = vpop.eup %1304 }
 0x252   : > { %684 = vadd.xlane.f32.xlu0 %v1305_v25  ;;  %v707_v26 = vpack.c.bf16 %v1305_v25, %v1305_v25 }
 0x254   : > { %1204 = vmatmul.mubr.bf16.vlgmr.msra.gmra.mrb[4].mxu0 %v707_v26 }
 0x255   : > { %v1307_v27 = vpop.eup %1306  ;;  %1235 = vmatprep.mubr.msk.bf16.mxu0 %vm1397_vm1, %v1396_v0  ;;  %1234 = vmatpush3.bf16.msra.mxu0 %v1303_v42 }
 0x256   : > { %686 = vadd.xlane.f32.xlu1 %v1307_v27  ;;  %v708_v28 = vpack.c.bf16 %v1307_v27, %v1307_v27  ;;  %v1309_v17 = vpop.eup %1308 }
 0x257   : > { %v1311_v30 = vpop.eup %1310  ;;  %v683_v37 = vmul.f32 %v1309_v17, %v681_v35 }
 0x258   : > { %1224 = vmatmul.mubr.bf16.vlgmr.msra.gmra.mrb[4].mxu1 %v708_v28  ;;  %v682_v33 = vmul.f32 %v1311_v30, %v680_v32 }
 0x259   : > { %1229 = vmatprep.mubr.msk.bf16.mxu1 %vm1397_vm1, %v1396_v0  ;;  %1228 = vmatpush3.bf16.msra.mxu1 %v1302_v31 }
 0x267   : > { %702 = vperm.xlu1 %1300, %v1309_v17  }
 0x268   : > { %697 = vperm.xlu0 %1301, %v1311_v30  }
 0x2df   : > { %v685_v34 = vpop.xlane.xlu0 %684 }
 0x2e0   : > { %v688_v36 = vadd.f32 %v685_v34, %v682_v33 }
 0x2e2   : > { %691 = vst.msk [vmem:[#allocation4] sm:$0xff] %vm407_vm3, %v688_v36 }
 0x2e3   : > { %v687_v0 = vpop.xlane.xlu1 %686 }
 0x2e4   : > { %v689_v38 = vadd.f32 %v687_v0, %v683_v37 }
 0x2e6   : > { %692 = vst.msk [vmem:[#allocation4 + $0x8] sm:$0xff] %vm407_vm3, %v689_v38 }
 0x2e7   : > { %v698_v45 = vpop.permute.xlu0 %697  ;;  %v703_v48 = vpop.permute.xlu1 %702 }
 0x2e8   : > { %v705_v46 = vmul.f32 %v698_v45, %v693_v44  ;;  %v706_v53 = vmul.f32 %v703_v48, %v694_v47 }
 0x2e9   : > { %v798_v39 = vld [vmem:[#allocation4] sm:$0xff] }
 0x2ea   : > { %1312 = vrcp.f32 %v798_v39 }
 0x2ed   : > { %v799_v40 = vld [vmem:[#allocation4 + $0x8] sm:$0xff] }
 0x2ee   : > { %1314 = vrcp.f32 %v799_v40 }
 0x2f4   : > { %v1313_v41 = vpop.eup %1312 }
 0x2f5   : > { %806 = vperm.xlu0 %1301, %v1313_v41  }
 0x2f8   : > { %v1315_v43 = vpop.eup %1314 }
 0x2f9   : > { %811 = vperm.xlu0 %1301, %v1315_v43  }
 0x327   : > { %v743_v49 = vpop.f32.mrb[4].mxu0 }
 0x328   : > { %v789_v50 = vadd.f32 %v743_v49, %v705_v46  ;;  %v1205_v51 = vpop.f32.mrb[5].mxu0 }
 0x329   : > { %v746_v52 = vpop.f32.mrb[6].mxu0 }
 0x32a   : > { %791 = vst.msk [vmem:[#allocation5] sm:$0xff] %vm412_vm0, %v789_v50  ;;  %v1206_v54 = vpop.f32.mrb[7].mxu0 }
 0x32b   : > { %v783_v55 = vpop.f32.mrb[4].mxu1 }
 0x32c   : > { %v790_v56 = vadd.f32 %v783_v55, %v706_v53  ;;  %v1225_v57 = vpop.f32.mrb[5].mxu1 }
 0x32d   : > { %v786_v58 = vpop.f32.mrb[6].mxu1 }
 0x32e   : > { %792 = vst.msk [vmem:[#allocation5 + $0x8] sm:$0xff] %vm412_vm0, %v790_v56  ;;  %v1226_v59 = vpop.f32.mrb[7].mxu1 }
 0x331   : > { %v802_v61 = vld [vmem:[#allocation5] sm:$0xff] }
 0x335   : > { %v803_v1 = vld [vmem:[#allocation5 + $0x8] sm:$0xff] }
 0x374   : > { %v807_v60 = vpop.permute.xlu0 %806 }
 0x375   : > { %v814_v62 = vmul.f32 %v807_v60, %v802_v61 }
 0x377   : > { %v816_v63 = vpack.c.bf16 %v814_v62, %v814_v62 }
 0x378   : > { %v812_v2 = vpop.permute.xlu0 %811 }
 0x379   : > { %v815_v3 = vmul.f32 %v812_v2, %v803_v1  ;;  %1230 = vmatmul.mubr.msk.bf16.vlgmr.msra.gmra.mrb[8].mxu1 %vm412_vm0, %v816_v63 }
 0x37b   : > { %v817_v4 = vpack.c.bf16 %v815_v3, %v815_v3 }
 0x37d   : > { %1236 = vmatmul.mubr.msk.bf16.vlgmr.msra.gmra.mrb[8].mxu0 %vm412_vm0, %v817_v4 }
 0x44c   : > { %v864_v6 = vpop.f32.mrb[8].mxu1 }
 0x44d   : > { %v1231_v7 = vpop.f32.mrb[9].mxu1  ;;  %v876_v9 = vadd.f32 %v1095_v5, %v864_v6 }
 0x44e   : > { %v867_v8 = vpop.f32.mrb[10].mxu1 }
 0x44f   : > { %v1232_v10 = vpop.f32.mrb[11].mxu1 }
 0x450   : > { %v923_v11 = vpop.f32.mrb[8].mxu0 }
 0x451   : > { %v929_v12 = vadd.f32 %v923_v11, %v876_v9  ;;  %v1237_v13 = vpop.f32.mrb[9].mxu0 }
 0x452   : > { %v926_v15 = vpop.f32.mrb[10].mxu0 }
 0x453   : > { %v1238_v16 = vpop.f32.mrb[11].mxu0  ;;  %931 = vst.msk [vmem:[%s354_s28] sm:$0xff] %vm930_vm4, %v929_v12 }
 0x454   : > { %1329 = shalt.err (!%p1326_p5)
}
 0x455   : > { %s1330_s17 = scalar_lea.hbm %s1702_s14, 128  ;;  %s1334_s20 = scalar_lea.hbm %s1755_s6, 256 }
 0x456   : > { %p1331_p6 = scmp.ne.s32.totalorder %s1702_s14, %s1330_s17  ;;  %p1335_p10 = scmp.lt.u32.totalorder %s1702_s14, %s1755_s6 }
 0x457   : > { %p1336_p11 = scmp.lt.u32.totalorder %s1334_s20, %s1330_s17  ;;  %p1338_p13 = scmp.lt.u32.totalorder %s1330_s17, %s1702_s14 }
 0x458   : > { %p1332_p7 = pnand %p1331_p6, %p1476_p4 }
 0x459   : > { %p1337_p12 = por %p1336_p11, %p1335_p10 }
 0x45a   : > { %p1333_p9 = pneg %p1332_p7 }
 0x45b   : > { %p1339_p0 = por %p1338_p13, %p1337_p12 }
 0x45d   : > { %p1340_p1 = pnand %p1339_p0, %p1333_p9 }
 0x45f   : > { %1343 = shalt.err (!%p1340_p1)
}
 0x460   : > { %1241 = dma.vmem_to_hbm [thread:$0]  (%p1476_p4), %s1704_s30, 128, %s1702_s14, %s933_s24  }
 0x461 PF: > { %p1247_p2 = scmp.ge.s32.totalorder %s1394_s26, 2  ;;  %s959_s8 = sand.u32 1, %s1374_s21  }
 0x462   : > { %s960_s13 = scalar_lea.sflag [#allocation7], %s959_s8 }
 0x463   : > { %p1244_p3 = pnand %p1247_p2, %p1483_p8 }
 0x465   : > { %1369 = dma.done.wait (!%p1244_p3), %s960_s13, 128  }
 0x466   : > { %1371 = vsyncadd (!%p1244_p3), %s960_s13, 4294967168  ;;  %s19_s26 = sadd.s32 1, %s1394_s26   ;;  %s1758_s21 = smov %s1378_s22 }
 0x467   : > { %p16_p5 = scmp.ge.s32.totalorder %s19_s26, 4   ;;  %s1759_s22 = smov %s1382_s23 }
 0x468   : > { %s1760_s23 = smov %s1489_s10  ;;  %s1761_s24 = smov %s1390_s25 }
 0x469   : > { %s1762_s25 = smov %s1764_s29  ;;  %18 = sbr.rel (!%p16_p5) target bundleno = 4 (0x4), region = 97 }
 0x470   :  { %965 = vsyncpa [#allocation7], 1 }
 0x471   :  { %967 = vsyncpa [#allocation7 + $0x1], 1 }

</bundles_post_ra>
